<compile_context>
chip_gen: v7x
topology: tpu7x:2x2x1
jax: 0.10.0
libtpu: 0.0.40
codegen_flags: <defaults>
</compile_context>

<pallas_src>
import jax
import jax.numpy as jnp
from jax.experimental import pallas as pl
from jax.experimental.pallas import tpu as pltpu

CIN, COUT = 64, 128
KH, KW = 3, 3
STRIDE = 2
PAD = 1
K = CIN * KH * KW  # 576


def _conv_add_kernel(p_ref, w_ref, o_ref):
    """out_tile = patches_tile @ (W1 + W2) — single MXU matmul, f32 accumulate."""
    o_ref[...] = jnp.dot(
        p_ref[...], w_ref[...], preferred_element_type=jnp.float32
    ).astype(o_ref.dtype)


def _im2col_nchw(x):
    """x: (N, Cin, H, W) -> patches (N*OH*OW, Cin*KH*KW).

    Column order is (cin slow, kh, kw fast), matching the PyTorch weight
    reshape (Cout, Cin*KH*KW)."""
    n, cin, h, w = x.shape
    oh = (h + 2 * PAD - KH) // STRIDE + 1
    ow = (w + 2 * PAD - KW) // STRIDE + 1
    xp = jnp.pad(x, ((0, 0), (0, 0), (PAD, PAD), (PAD, PAD)))
    slabs = []
    for kh in range(KH):
        for kw in range(KW):
            # (N, Cin, OH, OW)
            slabs.append(xp[:, :, kh:kh + STRIDE * oh:STRIDE,
                            kw:kw + STRIDE * ow:STRIDE])
    stacked = jnp.stack(slabs, axis=0)                 # (KH*KW, N, Cin, OH, OW)
    stacked = jnp.transpose(stacked, (1, 3, 4, 2, 0))  # (N, OH, OW, Cin, KH*KW)
    patches = stacked.reshape(n * oh * ow, cin * KH * KW)
    return patches, oh, ow


def _choose_tm(m):
    """Pick the M tile: big enough to amortize per-step overhead, >= 2 grid
    steps so both v7x TensorCores get work, sublane dim a multiple of 8."""
    tm = min(512, m)
    if m // tm < 2 and m >= 16:
        tm = m // 2
    return max(8, (tm // 8) * 8)


def simple_net_forward(x, w1, w2):
    """x: (N, 64, H, W) f32.  w1, w2: (128, 64, 3, 3) f32 (PyTorch OIHW layout).
    Returns conv1(x) + conv2(x) as (N, 128, H//2, W//2) f32 (NCHW)."""
    n = x.shape[0]

    # conv1(x) + conv2(x) == x conv (W1 + W2): fold the weights, one matmul.
    w_sum = (w1 + w2).reshape(COUT, K).T               # (K, Cout) — lane-dense Cout

    patches, oh, ow = _im2col_nchw(x)                  # (M, K)
    m_raw = patches.shape[0]

    tm = _choose_tm(m_raw)
    m_pad = pl.cdiv(m_raw, tm) * tm
    if m_pad != m_raw:
        # Pad M with zero rows so every grid step sees a full tile (no whole-M block).
        patches = jnp.pad(patches, ((0, m_pad - m_raw), (0, 0)))

    out_mat = pl.pallas_call(
        _conv_add_kernel,
        out_shape=jax.ShapeDtypeStruct((m_pad, COUT), jnp.float32),
        grid_spec=pltpu.PrefetchScalarGridSpec(
            num_scalar_prefetch=0,
            grid=(m_pad // tm,),
            in_specs=[
                pl.BlockSpec((tm, K), lambda i: (i, 0)),
                pl.BlockSpec((K, COUT), lambda i: (0, 0)),
            ],
            out_specs=pl.BlockSpec((tm, COUT), lambda i: (i, 0)),
        ),
        compiler_params=pltpu.CompilerParams(
            dimension_semantics=("parallel",),
            # Let XLA fuse the im2col producer into the kernel's patch input
            # (avoids materializing the 2.25x-inflated patch copy in HBM).
            allow_input_fusion=[True, False],
            # Above the 32 MiB scoped default, well under v7x's 64 MiB physical VMEM.
            vmem_limit_bytes=48 * 1024 * 1024,
        ),
    )(patches, w_sum)

    out = out_mat[:m_raw].reshape(n, oh, ow, COUT)     # NHWC, lane-dense Cout=128
    # NOTE: if the consumer accepts channels-last, return `out` directly and skip
    # this transpose (it costs an extra HBM pass). Kept to match PyTorch NCHW.
    return jnp.transpose(out, (0, 3, 1, 2))


def _reference(x, w1, w2):
    dn = jax.lax.conv_dimension_numbers(x.shape, w1.shape,
                                        ("NCHW", "OIHW", "NCHW"))
    c1 = jax.lax.conv_general_dilated(x, w1, (STRIDE, STRIDE),
                                      ((PAD, PAD), (PAD, PAD)),
                                      dimension_numbers=dn)
    c2 = jax.lax.conv_general_dilated(x, w2, (STRIDE, STRIDE),
                                      ((PAD, PAD), (PAD, PAD)),
                                      dimension_numbers=dn)
    return c1 + c2


if __name__ == "__main__":
    key = jax.random.PRNGKey(0)
    kx, k1, k2 = jax.random.split(key, 3)

    # Small shapes consistent with the module: N=2, Cin=64, H=W=16.
    x = jax.random.normal(kx, (2, CIN, 16, 16), dtype=jnp.float32)
    fan_in = CIN * KH * KW
    w1 = jax.random.normal(k1, (COUT, CIN, KH, KW), jnp.float32) * (fan_in ** -0.5)
    w2 = jax.random.normal(k2, (COUT, CIN, KH, KW), jnp.float32) * (fan_in ** -0.5)

    out = simple_net_forward(x, w1, w2)
    jax.block_until_ready(out)

    ref = _reference(x, w1, w2)
    assert out.shape == (2, COUT, 8, 8), out.shape
    assert jnp.allclose(out, ref, atol=1e-4, rtol=1e-4), "mismatch vs XLA conv reference"

    print("KERNEL_OK")
</pallas_src>

<mosaic_0001>
module attributes {stable_mosaic.version = 11 : i64} {
  func.func @_conv_add_kernel(%arg0: i32, %arg1: memref<64x576xf32, #tpu.memory_space<vmem>>, %arg2: memref<576x128xf32, #tpu.memory_space<vmem>>, %arg3: memref<64x128xf32, #tpu.memory_space<vmem>>) attributes {dimension_semantics = [#tpu.dimension_semantics<parallel>], iteration_bounds = array<i64: 2>, scalar_prefetch = 0 : i64, scratch_operands = 0 : i64, tpu.core_type = #tpu.core_type<tc>, window_params = [{transform_indices = @transform_0, window_bounds = array<i64: 64, 576>}, {pipeline_mode = #tpu.pipeline_mode<synchronous>, transform_indices = @transform_1, window_bounds = array<i64: 576, 128>}, {transform_indices = @transform_2, window_bounds = array<i64: 64, 128>}]} {
    %c0 = arith.constant 0 : index
    %c0_0 = arith.constant 0 : index
    %0 = vector.load %arg1[%c0, %c0_0] : memref<64x576xf32, #tpu.memory_space<vmem>>, vector<64x576xf32>
    %c0_1 = arith.constant 0 : index
    %c0_2 = arith.constant 0 : index
    %1 = vector.load %arg2[%c0_1, %c0_2] : memref<576x128xf32, #tpu.memory_space<vmem>>, vector<576x128xf32>
    %cst = arith.constant dense<0.000000e+00> : vector<64x128xf32>
    %2 = tpu.matmul %0, %1, %cst {dimension_numbers = #tpu.dot_dimension_numbers<[1], [0], [0], [1], [0, 0, 1, 1], [], []>} : vector<64x576xf32>, vector<576x128xf32>, vector<64x128xf32> -> vector<64x128xf32>
    %c0_3 = arith.constant 0 : index
    %c0_4 = arith.constant 0 : index
    %3 = vector.load %arg3[%c0_3, %c0_4] : memref<64x128xf32, #tpu.memory_space<vmem>>, vector<64x128xf32>
    tpu.vector_store %arg3[%c0_3, %c0_4], %2 {strides = array<i32>} : memref<64x128xf32, #tpu.memory_space<vmem>>, vector<64x128xf32>,
    return
  }
  func.func @transform_0(%arg0: i32) -> (i32, i32) {
    %c0_i32 = arith.constant 0 : i32
    %c0_i32_0 = arith.constant 0 : i32
    return %arg0, %c0_i32 : i32, i32
  }
  func.func @transform_1(%arg0: i32) -> (i32, i32) {
    %c0_i32 = arith.constant 0 : i32
    %c0_i32_0 = arith.constant 0 : i32
    %c0_i32_1 = arith.constant 0 : i32
    return %c0_i32, %c0_i32_0 : i32, i32
  }
  func.func @transform_2(%arg0: i32) -> (i32, i32) {
    %c0_i32 = arith.constant 0 : i32
    %c0_i32_0 = arith.constant 0 : i32
    return %arg0, %c0_i32 : i32, i32
  }
}

</mosaic_0001>

<bundles_post_ra>
// kernel: tpu_custom_call.1
= control target key start
LH: loop header
LB: loop body
LE: loop exit
PB: predicated region body
PF: predicated region fallthrough
CT: control target
= control target key end

     0   :  { %7 = vsyncpa [#allocation3], 0  ;;  %s1458_s0 = inlined_call_operand.vmem [shape: f32[128,576], index: 0, kind: input, shape index: {}]   ;;  %s1459_s1 = inlined_call_operand.vmem [shape: f32[576,128], index: 1, kind: input, shape index: {}]   ;;  %s1460_s2 = inlined_call_operand.hbm [shape: f32[128,128], index: 2, kind: output, shape index: {}]  }
   0x1   :  { %9 = vsyncpa [#allocation3 + $0x1], 0  ;;  %s1073_s9 = smov 0   ;;  %s1075_s10 = smov 0  }
   0x2   :  { %s1077_s11 = smov 0   ;;  %s1079_s12 = smov 0  }
   0x3 LB: > { %s1094_s13 = sadd.s32 4294967295, %s1053_s12   ;;  %s684_s14 = sadd.s32 4294967294, %s1053_s12   ;;  %s1053_s12 = sphi %s1079_s12, %s1467_s12   ;;  %s1049_s11 = sphi %s1077_s11, %s1466_s11   ;;  %s1045_s10 = sphi %s1075_s10, %s1465_s10   ;;  %s1041_s9 = sphi %s1073_s9, %s1464_s9  }
   0x4   : > { %s1098_s15 = sadd.s32 1, %s1053_s12   ;;  %s69_s16 = sadd.s32 1, %s1049_s11 }
   0x5   : > { %s66_s17 = ssub.s32 %s1053_s12, %s1098_s15  ;;  %p79_p0 = scmp.ne.s32.totalorder %s1049_s11, %s1045_s10 }
   0x6   : > { %p67_p1 = scmp.eq.s32.totalorder %s66_s17, 0  ;;  %p80_p2 = scmp.eq.s32.totalorder %s1094_s13, 1 }
   0x7   : > { %p85_p3 = scmp.ne.s32.totalorder %s1045_s10, %s1041_s9  ;;  %p86_p4 = scmp.eq.s32.totalorder %s684_s14, 1 }
   0x8   : > { %s1109_s18 = scalar_select %p67_p1, %s1049_s11, %s69_s16  }
   0x9   : > { %p1111_p5 = por %p80_p2, %p79_p0  ;;  %p1115_p6 = por %p86_p4, %p85_p3 }
   0xa   : > { %p687_p7 = scmp.ge.s32.totalorder %s1053_s12, 1  ;;  %p117_p8 = scmp.lt.s32.totalorder %s1053_s12, 3 }
   0xc   : > { %p118_p9 = pnand %p687_p7, %p117_p8 }
   0xd   : > { %v204_v0 = vld [vmem:[%s1459_s1 + $0x80] sm:$0xff] (!%p118_p9)  ;;  %v205_v1 = vld [vmem:[%s1459_s1 + $0x88] sm:$0xff] (!%p118_p9)  ;;  %v206_v11 = vld [vmem:[%s1459_s1 + $0x90] sm:$0xff] (!%p118_p9)  ;;  %s689_s26 = sshll.u32 (!%p118_p9), %s1094_s13, 3  ;;  %vm260_vm0 = vcmask (!%p118_p9), 523264   ;;  %s704_s25 = sshll.u32 (!%p118_p9), %s1094_s13, 10 }
   0xe   : > { %121 = sbr.rel (%p118_p9) target bundleno = 316 (0x13c), region = 28  ;;  %v236_v2 = vld [vmem:[%s1459_s1 + $0x180] sm:$0xff] (!%p118_p9)  ;;  %v861_v3 = vpack.c.bf16 (!%p118_p9), %v205_v1, %v204_v0  ;;  %v237_v4 = vld [vmem:[%s1459_s1 + $0x188] sm:$0xff] (!%p118_p9)  ;;  %v207_v13 = vld [vmem:[%s1459_s1 + $0x98] sm:$0xff] (!%p118_p9)  ;;  %p1187_p10 = scmp.lt.s32.totalorder (!%p118_p9), %s689_s26, 15 }
   0xf   : > { %v188_v5 = vld [vmem:[%s1459_s1] sm:$0xff] (!%p118_p9)  ;;  %v189_v6 = vld [vmem:[%s1459_s1 + $0x8] sm:$0xff] (!%p118_p9)  ;;  %v893_v7 = vpack.c.bf16 (!%p118_p9), %v237_v4, %v236_v2  ;;  %v238_v14 = vld [vmem:[%s1459_s1 + $0x190] sm:$0xff] (!%p118_p9)  ;;  %v865_v16 = vpack.c.bf16 (!%p118_p9), %v207_v13, %v206_v11  ;;  %s1411_s3 = scalar_lea.hbm (!%p118_p9), %s1460_s2, %s704_s25  ;;  %s1055_s5 = smov (!%p118_p9), [#allocation2]  }
  0x10   : > { %v863_v8 = vpack.c.bf16 (!%p118_p9), %v189_v6, %v188_v5  ;;  %v220_v9 = vld [vmem:[%s1459_s1 + $0x100] sm:$0xff] (!%p118_p9)  ;;  %v221_v10 = vld [vmem:[%s1459_s1 + $0x108] sm:$0xff] (!%p118_p9)  ;;  %862 = vmatprep.subr.bf16.mxu0 (!%p118_p9), %v861_v3  ;;  %v239_v15 = vld [vmem:[%s1459_s1 + $0x198] sm:$0xff] (!%p118_p9)  ;;  %s995_s6 = sshll.u32 (!%p118_p9), %s1055_s5, 4  ;;  %s996_s6 = int_to_ptr.vmem [resolvable:$false] %s995_s6 }
  0x11   : > { %v895_v12 = vpack.c.bf16 (!%p118_p9), %v221_v10, %v220_v9  ;;  %894 = vmatprep.subr.bf16.mxu1 (!%p118_p9), %v893_v7  ;;  %v897_v17 = vpack.c.bf16 (!%p118_p9), %v239_v15, %v238_v14  ;;  %v190_v18 = vld [vmem:[%s1459_s1 + $0x10] sm:$0xff] (!%p118_p9)  ;;  %v191_v19 = vld [vmem:[%s1459_s1 + $0x18] sm:$0xff] (!%p118_p9)  ;;  %v208_v23 = vld [vmem:[%s1459_s1 + $0xa0] sm:$0xff] (!%p118_p9)  ;;  %s997_s14 = scalar_lea.vmem (!%p118_p9), %s996_s6, 2048 }
  0x12   : > { %864 = vmatpush3.bf16.msra.mxu0 (!%p118_p9), %v863_v8  ;;  %v222_v20 = vld [vmem:[%s1459_s1 + $0x110] sm:$0xff] (!%p118_p9)  ;;  %v867_v21 = vpack.c.bf16 (!%p118_p9), %v191_v19, %v190_v18  ;;  %v223_v22 = vld [vmem:[%s1459_s1 + $0x118] sm:$0xff] (!%p118_p9)  ;;  %v209_v24 = vld [vmem:[%s1459_s1 + $0xa8] sm:$0xff] (!%p118_p9) }
  0x13   : > { %896 = vmatpush3.bf16.msra.mxu1 (!%p118_p9), %v895_v12  ;;  %866 = vmatprep.subr.bf16.mxu0 (!%p118_p9), %v865_v16  ;;  %v899_v25 = vpack.c.bf16 (!%p118_p9), %v223_v22, %v222_v20  ;;  %v869_v26 = vpack.c.bf16 (!%p118_p9), %v209_v24, %v208_v23  ;;  %v240_v27 = vld [vmem:[%s1459_s1 + $0x1a0] sm:$0xff] (!%p118_p9)  ;;  %v241_v28 = vld [vmem:[%s1459_s1 + $0x1a8] sm:$0xff] (!%p118_p9)  ;;  %v210_v35 = vld [vmem:[%s1459_s1 + $0xb0] sm:$0xff] (!%p118_p9) }
  0x14   : > { %898 = vmatprep.subr.bf16.mxu1 (!%p118_p9), %v897_v17  ;;  %v192_v29 = vld [vmem:[%s1459_s1 + $0x20] sm:$0xff] (!%p118_p9)  ;;  %v901_v30 = vpack.c.bf16 (!%p118_p9), %v241_v28, %v240_v27  ;;  %v193_v31 = vld [vmem:[%s1459_s1 + $0x28] sm:$0xff] (!%p118_p9)  ;;  %v211_v36 = vld [vmem:[%s1459_s1 + $0xb8] sm:$0xff] (!%p118_p9) }
  0x15   : > { %v224_v32 = vld [vmem:[%s1459_s1 + $0x120] sm:$0xff]  ;;  %v225_v33 = vld [vmem:[%s1459_s1 + $0x128] sm:$0xff]  ;;  %v871_v34 = vpack.c.bf16 %v193_v31, %v192_v29  ;;  %v242_v37 = vld [vmem:[%s1459_s1 + $0x1b0] sm:$0xff]  ;;  %v873_v39 = vpack.c.bf16 %v211_v36, %v210_v35  ;;  %s1469_s26 = smov (!%p1187_p10, %s689_s26), 15 }
  0x16   : > { %868 = vmatpush3.bf16.msra.mxu0 %v867_v21  ;;  %v903_v38 = vpack.c.bf16 %v225_v33, %v224_v32  ;;  %v243_v40 = vld [vmem:[%s1459_s1 + $0x1b8] sm:$0xff]  ;;  %v194_v41 = vld [vmem:[%s1459_s1 + $0x30] sm:$0xff]  ;;  %v212_v46 = vld [vmem:[%s1459_s1 + $0xc0] sm:$0xff]  ;;  %s949_s7 = smul.u32 40, %s1469_s26 }
  0x17   : > { %900 = vmatpush3.bf16.msra.mxu1 %v899_v25  ;;  %870 = vmatprep.subr.bf16.mxu0 %v869_v26  ;;  %v195_v42 = vld [vmem:[%s1459_s1 + $0x38] sm:$0xff]  ;;  %v905_v43 = vpack.c.bf16 %v243_v40, %v242_v37  ;;  %v226_v44 = vld [vmem:[%s1459_s1 + $0x130] sm:$0xff]  ;;  %v213_v47 = vld [vmem:[%s1459_s1 + $0xc8] sm:$0xff] }
  0x18   : > { %902 = vmatprep.subr.bf16.mxu1 %v901_v30  ;;  %v227_v45 = vld [vmem:[%s1459_s1 + $0x138] sm:$0xff]  ;;  %v244_v48 = vld [vmem:[%s1459_s1 + $0x1c0] sm:$0xff]  ;;  %v245_v49 = vld [vmem:[%s1459_s1 + $0x1c8] sm:$0xff]  ;;  %v875_v50 = vpack.c.bf16 %v195_v42, %v194_v41  ;;  %v877_v52 = vpack.c.bf16 %v213_v47, %v212_v46  ;;  %s1288_s8 = scalar_lea.vmem %s1458_s0, %s949_s7 }
  0x19   : > { %v907_v51 = vpack.c.bf16 %v227_v45, %v226_v44  ;;  %v196_v53 = vld [vmem:[%s1459_s1 + $0x40] sm:$0xff]  ;;  %v197_v54 = vld [vmem:[%s1459_s1 + $0x48] sm:$0xff]  ;;  %v909_v56 = vpack.c.bf16 %v245_v49, %v244_v48  ;;  %v214_v58 = vld [vmem:[%s1459_s1 + $0xd0] sm:$0xff] }
  0x1a   : > { %872 = vmatpush3.bf16.msra.mxu0 %v871_v34  ;;  %v228_v55 = vld [vmem:[%s1459_s1 + $0x140] sm:$0xff]  ;;  %v229_v57 = vld [vmem:[%s1459_s1 + $0x148] sm:$0xff]  ;;  %v215_v59 = vld [vmem:[%s1459_s1 + $0xd8] sm:$0xff]  ;;  %v879_v62 = vpack.c.bf16 %v197_v54, %v196_v53 }
  0x1b   : > { %904 = vmatpush3.bf16.msra.mxu1 %v903_v38  ;;  %874 = vmatprep.subr.bf16.mxu0 %v873_v39  ;;  %v246_v60 = vld [vmem:[%s1459_s1 + $0x1d0] sm:$0xff]  ;;  %v247_v61 = vld [vmem:[%s1459_s1 + $0x1d8] sm:$0xff]  ;;  %v911_v63 = vpack.c.bf16 %v229_v57, %v228_v55  ;;  %v881_v0 = vpack.c.bf16 %v215_v59, %v214_v58  ;;  %v216_v6 = vld [vmem:[%s1459_s1 + $0xe0] sm:$0xff] }
  0x1c   : > { %906 = vmatprep.subr.bf16.mxu1 %v905_v43  ;;  %v198_v1 = vld [vmem:[%s1459_s1 + $0x50] sm:$0xff]  ;;  %v199_v2 = vld [vmem:[%s1459_s1 + $0x58] sm:$0xff]  ;;  %v913_v4 = vpack.c.bf16 %v247_v61, %v246_v60  ;;  %v217_v7 = vld [vmem:[%s1459_s1 + $0xe8] sm:$0xff] }
  0x1d   : > { %v230_v3 = vld [vmem:[%s1459_s1 + $0x150] sm:$0xff]  ;;  %v231_v5 = vld [vmem:[%s1459_s1 + $0x158] sm:$0xff]  ;;  %v248_v8 = vld [vmem:[%s1459_s1 + $0x1e0] sm:$0xff]  ;;  %v883_v10 = vpack.c.bf16 %v199_v2, %v198_v1  ;;  %v885_v14 = vpack.c.bf16 %v217_v7, %v216_v6 }
  0x1e   : > { %876 = vmatpush3.bf16.msra.mxu0 %v875_v50  ;;  %v249_v9 = vld [vmem:[%s1459_s1 + $0x1e8] sm:$0xff]  ;;  %v200_v11 = vld [vmem:[%s1459_s1 + $0x60] sm:$0xff]  ;;  %v915_v13 = vpack.c.bf16 %v231_v5, %v230_v3  ;;  %v151_v17 = vld [vmem:[%s1288_s8 + $0x18] sm:$0xff] }
  0x1f   : > { %908 = vmatpush3.bf16.msra.mxu1 %v907_v51  ;;  %878 = vmatprep.subr.bf16.mxu0 %v877_v52  ;;  %v201_v12 = vld [vmem:[%s1459_s1 + $0x68] sm:$0xff]  ;;  %v232_v15 = vld [vmem:[%s1459_s1 + $0x160] sm:$0xff]  ;;  %v917_v18 = vpack.c.bf16 %v249_v9, %v248_v8  ;;  %v218_v20 = vld [vmem:[%s1459_s1 + $0xf0] sm:$0xff] }
  0x20   : > { %910 = vmatprep.subr.bf16.mxu1 %v909_v56  ;;  %v149_v16 = vld [vmem:[%s1288_s8 + $0x8] sm:$0xff]  ;;  %v219_v21 = vld [vmem:[%s1459_s1 + $0xf8] sm:$0xff]  ;;  %v250_v22 = vld [vmem:[%s1459_s1 + $0x1f0] sm:$0xff]  ;;  %454 = vmatprep.mubr.f32.mxu1 %v151_v17  ;;  %v887_v24 = vpack.c.bf16 %v201_v12, %v200_v11 }
  0x21   : > { %v233_v19 = vld [vmem:[%s1459_s1 + $0x168] sm:$0xff]  ;;  %349 = vmatprep.mubr.f32.mxu0 %v149_v16  ;;  %v251_v23 = vld [vmem:[%s1459_s1 + $0x1f8] sm:$0xff]  ;;  %v889_v26 = vpack.c.bf16 %v219_v21, %v218_v20  ;;  %v202_v27 = vld [vmem:[%s1459_s1 + $0x70] sm:$0xff] }
  0x22   : > { %880 = vmatpush3.bf16.msra.mxu0 %v879_v62  ;;  %v919_v25 = vpack.c.bf16 %v233_v19, %v232_v15  ;;  %v203_v28 = vld [vmem:[%s1459_s1 + $0x78] sm:$0xff]  ;;  %v234_v29 = vld [vmem:[%s1459_s1 + $0x170] sm:$0xff]  ;;  %v921_v30 = vpack.c.bf16 %v251_v23, %v250_v22  ;;  %v252_v32 = vld [vmem:[%s1459_s1 + $0x200] sm:$0xff] }
  0x23   : > { %912 = vmatpush3.bf16.msra.mxu1 %v911_v63  ;;  %882 = vmatprep.subr.bf16.mxu0 %v881_v0  ;;  %v235_v31 = vld [vmem:[%s1459_s1 + $0x178] sm:$0xff]  ;;  %v253_v33 = vld [vmem:[%s1459_s1 + $0x208] sm:$0xff]  ;;  %v891_v34 = vpack.c.bf16 %v203_v28, %v202_v27  ;;  %v254_v37 = vld [vmem:[%s1459_s1 + $0x210] sm:$0xff] }
  0x24   : > { %914 = vmatprep.subr.bf16.mxu1 %v913_v4  ;;  %v923_v35 = vpack.c.bf16 %v235_v31, %v234_v29  ;;  %v925_v36 = vpack.c.bf16 %v253_v33, %v252_v32  ;;  %v255_v38 = vld [vmem:[%s1459_s1 + $0x218] sm:$0xff]  ;;  %v148_v39 = vld [vmem:[%s1288_s8] sm:$0xff]  ;;  %v150_v40 = vld [vmem:[%s1288_s8 + $0x10] sm:$0xff] }
  0x25   : > { %v154_v41 = vld [vmem:[%s1288_s8 + $0x30] sm:$0xff]  ;;  %v929_v42 = vpack.c.bf16 %v255_v38, %v254_v37  ;;  %v156_v43 = vld [vmem:[%s1288_s8 + $0x40] sm:$0xff]  ;;  %v257_v45 = vld [vmem:[%s1459_s1 + $0x228] sm:$0xff] }
  0x26   : > { %884 = vmatpush3.bf16.msra.mxu0 %v883_v10  ;;  %v256_v44 = vld [vmem:[%s1459_s1 + $0x220] sm:$0xff]  ;;  %v153_v46 = vld [vmem:[%s1288_s8 + $0x28] sm:$0xff]  ;;  %v155_v47 = vld [vmem:[%s1288_s8 + $0x38] sm:$0xff] }
  0x27   : > { %916 = vmatpush3.bf16.msra.mxu1 %v915_v13  ;;  %886 = vmatprep.subr.bf16.mxu0 %v885_v14  ;;  %v159_v48 = vld [vmem:[%s1288_s8 + $0x58] sm:$0xff]  ;;  %v161_v49 = vld [vmem:[%s1288_s8 + $0x68] sm:$0xff]  ;;  %v933_v50 = vpack.c.bf16 %v257_v45, %v256_v44  ;;  %v258_v51 = vld [vmem:[%s1459_s1 + $0x230] sm:$0xff] }
  0x28   : > { %918 = vmatprep.subr.bf16.mxu1 %v917_v18  ;;  %v259_v52 = vld [vmem:[%s1459_s1 + $0x238] sm:$0xff]  ;;  %v158_v53 = vld [vmem:[%s1288_s8 + $0x50] sm:$0xff]  ;;  %v160_v54 = vld [vmem:[%s1288_s8 + $0x60] sm:$0xff] }
  0x29   : > { %v164_v55 = vld [vmem:[%s1288_s8 + $0x80] sm:$0xff]  ;;  %v166_v56 = vld [vmem:[%s1288_s8 + $0x90] sm:$0xff]  ;;  %v937_v57 = vpack.c.bf16 %v259_v52, %v258_v51  ;;  %v163_v58 = vld [vmem:[%s1288_s8 + $0x78] sm:$0xff] }
  0x2a   : > { %888 = vmatpush3.bf16.msra.mxu0 %v887_v24  ;;  %v165_v59 = vld [vmem:[%s1288_s8 + $0x88] sm:$0xff]  ;;  %v171_v61 = vld [vmem:[%s1288_s8 + $0xb8] sm:$0xff]  ;;  %v168_v62 = vld [vmem:[%s1288_s8 + $0xa0] sm:$0xff] }
  0x2b   : > { %920 = vmatpush3.bf16.msra.mxu1 %v919_v25  ;;  %890 = vmatprep.subr.bf16.mxu0 %v889_v26  ;;  %v169_v60 = vld [vmem:[%s1288_s8 + $0xa8] sm:$0xff]  ;;  %v170_v63 = vld [vmem:[%s1288_s8 + $0xb0] sm:$0xff]  ;;  %v176_v1 = vld [vmem:[%s1288_s8 + $0xe0] sm:$0xff] }
  0x2c   : > { %922 = vmatprep.subr.bf16.mxu1 %v921_v30  ;;  %v174_v0 = vld [vmem:[%s1288_s8 + $0xd0] sm:$0xff]  ;;  %v173_v2 = vld [vmem:[%s1288_s8 + $0xc8] sm:$0xff]  ;;  %v175_v3 = vld [vmem:[%s1288_s8 + $0xd8] sm:$0xff] }
  0x2d   : > { %v179_v4 = vld [vmem:[%s1288_s8 + $0xf8] sm:$0xff]  ;;  %v181_v5 = vld [vmem:[%s1288_s8 + $0x108] sm:$0xff]  ;;  %v178_v6 = vld [vmem:[%s1288_s8 + $0xf0] sm:$0xff] }
  0x2e   : > { %892 = vmatpush3.bf16.msra.mxu0 %v891_v34  ;;  %v180_v7 = vld [vmem:[%s1288_s8 + $0x100] sm:$0xff]  ;;  %v186_v9 = vld [vmem:[%s1288_s8 + $0x130] sm:$0xff]  ;;  %v183_v10 = vld [vmem:[%s1288_s8 + $0x118] sm:$0xff] }
  0x2f   : > { %924 = vmatpush3.bf16.msra.mxu1 %v923_v35  ;;  %926 = vmatprep.subr.bf16.mxu0 %v925_v36  ;;  %v184_v8 = vld [vmem:[%s1288_s8 + $0x120] sm:$0xff]  ;;  %v185_v11 = vld [vmem:[%s1288_s8 + $0x128] sm:$0xff]  ;;  %v162_v16 = vld [vmem:[%s1288_s8 + $0x70] sm:$0xff] }
  0x30   : > { %941 = vmatprep.subr.bf16.mxu1 %v925_v36  ;;  %v152_v12 = vld [vmem:[%s1288_s8 + $0x20] sm:$0xff]  ;;  %v157_v14 = vld [vmem:[%s1288_s8 + $0x48] sm:$0xff]  ;;  %v182_v17 = vld [vmem:[%s1288_s8 + $0x110] sm:$0xff] }
  0x31   : > { %350 = vmatmul.mubr.f32.vlgmr.msra.gmra.mrb[0].mxu0 %v148_v39  ;;  %v172_v13 = vld [vmem:[%s1288_s8 + $0xc0] sm:$0xff]  ;;  %v177_v15 = vld [vmem:[%s1288_s8 + $0xe8] sm:$0xff]  ;;  %v167_v18 = vld [vmem:[%s1288_s8 + $0x98] sm:$0xff] }
  0x32   : > { %455 = vmatmul.mubr.f32.vlgmr.msra.gmra.mrb[0].mxu1 %v150_v40  ;;  %928 = vmatpush3.bf16.msra.mxu0 %v925_v36  ;;  %v187_v19 = vld [vmem:[%s1288_s8 + $0x138] sm:$0xff]  ;;  %s137_s8 = sand.u32 1, %s1045_s10  }
  0x33   : > { %945 = vmatpush3.bf16.msra.mxu1 %v925_v36  ;;  %354 = vmatprep.mubr.f32.mxu0 %v154_v41  ;;  %s688_s7 = sshll.u32 %s137_s8, 6  ;;  %s1417_s13 = scalar_lea.sflag [#allocation3], %s137_s8 }
  0x34   : > { %459 = vmatprep.mubr.f32.mxu1 %v156_v43  ;;  %930 = vmatprep.subr.bf16.mxu0 %v929_v42  ;;  %s139_s24 = scalar_lea.vmem [#allocation2], %s688_s7 }
  0x35   : > { %355 = vmatmul.mubr.f32.gmra.mrb[2].mxu0 %v153_v46  ;;  %942 = vmatprep.subr.bf16.mxu1 %v929_v42  ;;  %s622_s28 = sshll.u32 %s139_s24, 4  ;;  %s1413_s28 = int_to_ptr.vmem [resolvable:$true] %s622_s28 }
  0x36   : > { %460 = vmatmul.mubr.f32.gmra.mrb[2].mxu1 %v155_v47  ;;  %359 = vmatprep.mubr.f32.mxu0 %v159_v48  ;;  %s991_s4 = scalar_lea.vmem %s1413_s28, 1024  ;;  %p998_p0 = scmp.lt.s32.totalorder %s1413_s28, %s996_s6 }
  0x37   : > { %464 = vmatprep.mubr.f32.mxu1 %v161_v49  ;;  %932 = vmatpush3.bf16.msra.mxu0 %v929_v42  ;;  %p992_p11 = scmp.ne.s32.totalorder %s1413_s28, %s991_s4  ;;  %p999_p1 = scmp.lt.s32.totalorder %s997_s14, %s991_s4 }
  0x38   : > { %946 = vmatpush3.bf16.msra.mxu1 %v929_v42  ;;  %934 = vmatprep.subr.bf16.mxu0 %v933_v50 }
  0x39   : > { %360 = vmatmul.mubr.f32.gmra.mrb[4].mxu0 %v158_v53  ;;  %943 = vmatprep.subr.bf16.mxu1 %v933_v50  ;;  %p993_p12 = pnand %p992_p11, %p1111_p5  ;;  %p1000_p2 = por %p999_p1, %p998_p0 }
  0x3a   : > { %465 = vmatmul.mubr.f32.gmra.mrb[4].mxu1 %v160_v54  ;;  %364 = vmatprep.mubr.f32.mxu0 %v164_v55 }
  0x3b   : > { %469 = vmatprep.mubr.f32.mxu1 %v166_v56  ;;  %936 = vmatpush3.bf16.msra.mxu0 %v933_v50  ;;  %p994_p13 = pneg %p993_p12 }
  0x3c   : > { %947 = vmatpush3.bf16.msra.mxu1 %v933_v50  ;;  %938 = vmatprep.subr.bf16.mxu0 %v937_v57 }
  0x3d   : > { %365 = vmatmul.mubr.f32.gmra.mrb[6].mxu0 %v163_v58  ;;  %944 = vmatprep.subr.bf16.mxu1 %v937_v57  ;;  %p1001_p3 = pnand %p1000_p2, %p994_p13 }
  0x3e   : > { %470 = vmatmul.mubr.f32.gmra.mrb[6].mxu1 %v165_v59  ;;  %369 = vmatprep.mubr.f32.mxu0 %v169_v60 }
  0x3f   : > { %474 = vmatprep.mubr.f32.mxu1 %v171_v61  ;;  %940 = vmatpush3.bf16.msra.mxu0 %v937_v57 }
  0x40   : > { %948 = vmatpush3.bf16.msra.mxu1 %v937_v57 }
  0x41   : > { %370 = vmatmul.mubr.f32.gmra.mrb[8].mxu0 %v168_v62 }
  0x42   : > { %475 = vmatmul.mubr.f32.gmra.mrb[8].mxu1 %v170_v63  ;;  %374 = vmatprep.mubr.f32.mxu0 %v174_v0 }
  0x43   : > { %479 = vmatprep.mubr.f32.mxu1 %v176_v1 }
  0x45   : > { %375 = vmatmul.mubr.f32.gmra.mrb[10].mxu0 %v173_v2 }
  0x46   : > { %480 = vmatmul.mubr.f32.gmra.mrb[10].mxu1 %v175_v3  ;;  %379 = vmatprep.mubr.f32.mxu0 %v179_v4 }
  0x47   : > { %484 = vmatprep.mubr.f32.mxu1 %v181_v5 }
  0x49   : > { %380 = vmatmul.mubr.f32.gmra.mrb[12].mxu0 %v178_v6 }
  0x4a   : > { %485 = vmatmul.mubr.f32.gmra.mrb[12].mxu1 %v180_v7  ;;  %384 = vmatprep.mubr.f32.mxu0 %v184_v8 }
  0x4b   : > { %489 = vmatprep.mubr.f32.mxu1 %v186_v9 }
  0x4d   : > { %385 = vmatmul.mubr.f32.gmra.mrb[14].mxu0 %v183_v10 }
  0x4e   : > { %490 = vmatmul.mubr.f32.gmra.mrb[14].mxu1 %v185_v11  ;;  %849 = vmatprep.mubr.msk.f32.mxu0 %vm260_vm0, %v152_v12 }
  0x4f   : > { %855 = vmatprep.mubr.msk.f32.mxu1 %vm260_vm0, %v172_v13 }
  0x51   : > { %850 = vmatmul.mubr.msk.f32.vlgmr.msra.gmra.mrb[16].mxu0 %vm260_vm0, %v157_v14 }
  0x52   : > { %856 = vmatmul.mubr.msk.f32.vlgmr.msra.gmra.mrb[16].mxu1 %vm260_vm0, %v177_v15  ;;  %852 = vmatprep.mubr.msk.f32.mxu0 %vm260_vm0, %v162_v16 }
  0x53   : > { %858 = vmatprep.mubr.msk.f32.mxu1 %vm260_vm0, %v182_v17 }
  0x55   : > { %853 = vmatmul.mubr.msk.f32.gmra.mrb[18].mxu0 %vm260_vm0, %v167_v18 }
  0x56   : > { %859 = vmatmul.mubr.msk.f32.gmra.mrb[18].mxu1 %vm260_vm0, %v187_v19 }
 0x104   : > { %v737_v20 = vpop.f32.mrb[0].mxu0 }
 0x105   : > { %v793_v21 = vpop.f32.mrb[0].mxu1  ;;  %v738_v22 = vpop.f32.mrb[1].mxu0 }
 0x106   : > { %v739_v23 = vadd.f32 %v738_v22, %v737_v20  ;;  %v794_v24 = vpop.f32.mrb[1].mxu1 }
 0x107   : > { %v795_v25 = vadd.f32 %v794_v24, %v793_v21 }
 0x108   : > { %v740_v26 = vpop.f32.mrb[2].mxu0 }
 0x109   : > { %v796_v27 = vpop.f32.mrb[2].mxu1  ;;  %v741_v28 = vpop.f32.mrb[3].mxu0  ;;  %v457_v29 = vadd.f32 %v795_v25, %v739_v23 }
 0x10a   : > { %v742_v30 = vadd.f32 %v741_v28, %v740_v26  ;;  %v797_v31 = vpop.f32.mrb[3].mxu1 }
 0x10b   : > { %v798_v32 = vadd.f32 %v797_v31, %v796_v27 }
 0x10c   : > { %v743_v33 = vpop.f32.mrb[4].mxu0 }
 0x10d   : > { %v799_v34 = vpop.f32.mrb[4].mxu1  ;;  %v744_v35 = vpop.f32.mrb[5].mxu0  ;;  %v462_v36 = vadd.f32 %v798_v32, %v742_v30 }
 0x10e   : > { %v745_v37 = vadd.f32 %v744_v35, %v743_v33  ;;  %v800_v38 = vpop.f32.mrb[5].mxu1 }
 0x10f   : > { %v801_v39 = vadd.f32 %v800_v38, %v799_v34 }
 0x110   : > { %v746_v40 = vpop.f32.mrb[6].mxu0 }
 0x111   : > { %v802_v41 = vpop.f32.mrb[6].mxu1  ;;  %v747_v42 = vpop.f32.mrb[7].mxu0  ;;  %v467_v43 = vadd.f32 %v801_v39, %v745_v37 }
 0x112   : > { %v748_v44 = vadd.f32 %v747_v42, %v746_v40  ;;  %v803_v45 = vpop.f32.mrb[7].mxu1 }
 0x113   : > { %v804_v46 = vadd.f32 %v803_v45, %v802_v41 }
 0x114   : > { %v749_v47 = vpop.f32.mrb[8].mxu0 }
 0x115   : > { %v805_v48 = vpop.f32.mrb[8].mxu1  ;;  %v750_v49 = vpop.f32.mrb[9].mxu0  ;;  %v472_v50 = vadd.f32 %v804_v46, %v748_v44 }
 0x116   : > { %v751_v51 = vadd.f32 %v750_v49, %v749_v47  ;;  %v806_v52 = vpop.f32.mrb[9].mxu1 }
 0x117   : > { %v807_v53 = vadd.f32 %v806_v52, %v805_v48 }
 0x118   : > { %v752_v54 = vpop.f32.mrb[10].mxu0 }
 0x119   : > { %v808_v55 = vpop.f32.mrb[10].mxu1  ;;  %v753_v56 = vpop.f32.mrb[11].mxu0  ;;  %v477_v57 = vadd.f32 %v807_v53, %v751_v51 }
 0x11a   : > { %v754_v58 = vadd.f32 %v753_v56, %v752_v54  ;;  %v809_v59 = vpop.f32.mrb[11].mxu1 }
 0x11b   : > { %v810_v60 = vadd.f32 %v809_v59, %v808_v55 }
 0x11c   : > { %v755_v61 = vpop.f32.mrb[12].mxu0 }
 0x11d   : > { %v811_v62 = vpop.f32.mrb[12].mxu1  ;;  %v756_v63 = vpop.f32.mrb[13].mxu0  ;;  %v482_v0 = vadd.f32 %v810_v60, %v754_v58 }
 0x11e   : > { %v757_v1 = vadd.f32 %v756_v63, %v755_v61  ;;  %v812_v2 = vpop.f32.mrb[13].mxu1 }
 0x11f   : > { %v813_v3 = vadd.f32 %v812_v2, %v811_v62 }
 0x120   : > { %v758_v4 = vpop.f32.mrb[14].mxu0 }
 0x121   : > { %v814_v5 = vpop.f32.mrb[14].mxu1  ;;  %v759_v6 = vpop.f32.mrb[15].mxu0  ;;  %v487_v7 = vadd.f32 %v813_v3, %v757_v1 }
 0x122   : > { %v760_v8 = vadd.f32 %v759_v6, %v758_v4  ;;  %v815_v9 = vpop.f32.mrb[15].mxu1 }
 0x123   : > { %v816_v10 = vadd.f32 %v815_v9, %v814_v5 }
 0x124   : > { %v851_v11 = vpop.f32.mrb[16].mxu0 }
 0x125   : > { %v567_v12 = vadd.f32 %v851_v11, %v462_v36  ;;  %v857_v13 = vpop.f32.mrb[16].mxu1  ;;  %v561_v14 = vpop.f32.mrb[17].mxu0  ;;  %v492_v15 = vadd.f32 %v816_v10, %v760_v8 }
 0x126   : > { %v587_v16 = vadd.f32 %v857_v13, %v482_v0  ;;  %v562_v17 = vadd.f32 %v561_v14, %v457_v29  ;;  %v581_v18 = vpop.f32.mrb[17].mxu1 }
 0x127   : > { %601 = vst [vmem:[%s139_s24 + $0x8] sm:$0xff] %v567_v12  ;;  %v582_v19 = vadd.f32 %v581_v18, %v477_v57 }
 0x128   : > { %605 = vst [vmem:[%s139_s24 + $0x28] sm:$0xff] %v587_v16  ;;  %600 = vst [vmem:[%s139_s24] sm:$0xff] %v562_v17  ;;  %v854_v20 = vpop.f32.mrb[18].mxu0 }
 0x129   : > { %604 = vst [vmem:[%s139_s24 + $0x20] sm:$0xff] %v582_v19  ;;  %v577_v21 = vadd.f32 %v854_v20, %v472_v50  ;;  %v860_v22 = vpop.f32.mrb[18].mxu1  ;;  %v571_v23 = vpop.f32.mrb[19].mxu0 }
 0x12a   : > { %v597_v24 = vadd.f32 %v860_v22, %v492_v15  ;;  %v572_v25 = vadd.f32 %v571_v23, %v467_v43  ;;  %v591_v26 = vpop.f32.mrb[19].mxu1 }
 0x12b   : > { %603 = vst [vmem:[%s139_s24 + $0x18] sm:$0xff] %v577_v21  ;;  %v592_v27 = vadd.f32 %v591_v26, %v487_v7 }
 0x12c   : > { %607 = vst [vmem:[%s139_s24 + $0x38] sm:$0xff] %v597_v24  ;;  %602 = vst [vmem:[%s139_s24 + $0x10] sm:$0xff] %v572_v25 }
 0x12d   : > { %606 = vst [vmem:[%s139_s24 + $0x30] sm:$0xff] %v592_v27 }
 0x12e   : > { %1004 = shalt.err (!%p1001_p3)
}
 0x12f   : > { %s1005_s16 = scalar_lea.hbm %s1411_s3, 1024  ;;  %s1009_s27 = scalar_lea.hbm %s1460_s2, 2048 }
 0x130   : > { %p1006_p4 = scmp.ne.s32.totalorder %s1411_s3, %s1005_s16  ;;  %p1010_p9 = scmp.lt.u32.totalorder %s1411_s3, %s1460_s2 }
 0x131   : > { %p1011_p10 = scmp.lt.u32.totalorder %s1009_s27, %s1005_s16  ;;  %p1013_p12 = scmp.lt.u32.totalorder %s1005_s16, %s1411_s3 }
 0x132   : > { %p1007_p7 = pnand %p1006_p4, %p1111_p5 }
 0x133   : > { %p1012_p11 = por %p1011_p10, %p1010_p9 }
 0x134   : > { %p1008_p8 = pneg %p1007_p7 }
 0x135   : > { %p1014_p13 = por %p1013_p12, %p1012_p11 }
 0x137   : > { %p1015_p0 = pnand %p1014_p13, %p1008_p8 }
 0x139   : > { %1018 = shalt.err (!%p1015_p0)
}
 0x13a   : > { %s1056_s23 = smov 128   ;;  %s1057_s8 = smov 8  }
 0x13b   : > { %950 = dma.vmem_to_hbm [thread:$0]  (%p1111_p5), %s1413_s28, 1024, %s1411_s3, %s1417_s13, %s1056_s23, %s1056_s23, %s1057_s8  }
 0x13c PF: > { %p956_p1 = scmp.ge.s32.totalorder %s1053_s12, 2  ;;  %s637_s7 = sand.u32 1, %s1041_s9  }
 0x13d   : > { %s638_s24 = scalar_lea.sflag [#allocation3], %s637_s7 }
 0x13e   : > { %p953_p2 = pnand %p956_p1, %p1115_p6 }
 0x140   : > { %1036 = dma.done.wait (!%p953_p2), %s638_s24, 1024  }
 0x141   : > { %1038 = vsyncadd (!%p953_p2), %s638_s24, 4294966272  ;;  %p12_p3 = scmp.ge.s32.totalorder %s1098_s15, 4   ;;  %s1464_s9 = smov %s1045_s10 }
 0x142   : > { %s1465_s10 = smov %s1049_s11  ;;  %s1466_s11 = smov %s1109_s18 }
 0x143   : > { %s1467_s12 = smov %s1098_s15  ;;  %14 = sbr.rel (!%p12_p3) target bundleno = 3 (0x3), region = 63 }
 0x14a   :  { %643 = vsyncpa [#allocation3], 1 }
 0x14b   :  { %645 = vsyncpa [#allocation3 + $0x1], 1 }

</bundles_post_ra>
